<compile_context>
chip_gen: v7x
topology: tpu7x:2x2x1
jax: 0.10.0
libtpu: 0.0.40
codegen_flags: <defaults>
</compile_context>

<pallas_src>
import functools

import jax
import jax.numpy as jnp
from jax.experimental import pallas as pl
from jax.experimental.pallas import tpu as pltpu


def qlinear_kernel(inp_ref, wt_ref, rowsum_ref, scale_ref, wzps_ref, colterm_ref,
                   out_ref, acc_ref, *, int8_mxu):
    """One (i, j, k) grid step of out = dequant(inp) @ dequant(weight).T + bias."""
    k = pl.program_id(2)

    @pl.when(k == 0)
    def _init():
        acc_ref[...] = jnp.zeros_like(acc_ref)

    if int8_mxu:
        # Native int8 MXU path (v5e / v6e): exact int32 accumulation,
        # zero per-step elementwise work.
        acc_ref[...] += jnp.dot(inp_ref[...], wt_ref[...],
                                preferred_element_type=jnp.int32)
    else:
        # v7x / fallback path: int8 values are exact in bf16; single direct cast
        # per operand, f32 accumulation on the MXU.
        acc_ref[...] += jnp.dot(inp_ref[...].astype(jnp.bfloat16),
                                wt_ref[...].astype(jnp.bfloat16),
                                preferred_element_type=jnp.float32)

    @pl.when(k == pl.num_programs(2) - 1)
    def _finalize():
        # out = scale*(A@Wt - izp*colsum_W - rowsum_A*wzp + K*izp*wzp) + bias
        #     = scale*acc - rowsum_A*(scale*wzp) + colterm
        acc = acc_ref[...].astype(jnp.float32)
        out_ref[...] = (acc * scale_ref[...]
                        - rowsum_ref[...] * wzps_ref[...]
                        + colterm_ref[...])


def _mxu_has_int8():
    """int8 MXU mode exists on v5e/v5p/v6e; v7x is fp8/bf16-only; <=v4 bf16-only."""
    try:
        kind = jax.devices()[0].device_kind.lower()
    except Exception:
        return False
    return ("v5" in kind) or ("v6" in kind)


def _pick_tile(dim, cap, align):
    """Largest tile <= cap that divides dim and is a multiple of align (or dim itself)."""
    if dim <= cap:
        return dim
    t = (cap // align) * align
    while t >= align:
        if dim % t == 0:
            return t
        t -= align
    raise ValueError(f"no {align}-aligned tile <= {cap} divides dim={dim}")


def qlinear_prepare(weight, bias, inp_scale, inp_zero_point,
                    weight_scales, weight_zero_points):
    """One-time (model-load) prep: pre-transposed int8 weight + folded per-channel vectors.

    weight: int8 [N, K] (nn.Linear layout); bias: f32 [N];
    inp_scale / inp_zero_point: per-tensor scalars; weight_scales / weight_zero_points: [N].
    """
    N, K = weight.shape
    w_t = weight.T                                                   # [K, N] int8 (store once)
    iscale = jnp.asarray(inp_scale, jnp.float32)
    izp = jnp.asarray(inp_zero_point, jnp.float32)
    wscale = weight_scales.astype(jnp.float32).reshape(1, N)
    wzp = weight_zero_points.astype(jnp.float32).reshape(1, N)
    scale = iscale * wscale                                          # [1, N] combined scale
    colsum_w = jnp.sum(w_t.astype(jnp.int32), axis=0).astype(jnp.float32).reshape(1, N)
    colterm = (scale * (jnp.float32(K) * izp * wzp - izp * colsum_w)
               + bias.astype(jnp.float32).reshape(1, N))             # [1, N]
    wzp_scaled = scale * wzp                                         # [1, N]
    return {"w_t": w_t, "scale": scale, "wzp_scaled": wzp_scaled, "colterm": colterm}


def qlinear_pallas_prepared(inp, prepared, *, tm=None, tn=None, tk=None,
                            use_int8_mxu=None):
    """inp: int8 [M, K]; prepared: output of qlinear_prepare. Returns f32 [M, N]."""
    w_t = prepared["w_t"]
    M, K = inp.shape
    K2, N = w_t.shape
    assert K == K2

    if use_int8_mxu is None:
        use_int8_mxu = _mxu_has_int8()
    use_int8_mxu = bool(use_int8_mxu)

    # Large default tiles (amortize ~0.35us/step, keep the 256-wide MXUs busy),
    # shrunk to divisors of the problem. tm aligned to 32 (int8 sublane packing).
    tm = _pick_tile(M, 512 if tm is None else tm, 32)
    tn = _pick_tile(N, 512 if tn is None else tn, 128)
    tk = _pick_tile(K, 2048 if tk is None else tk, 128)
    # v7x megacore: keep at least 2 parallel output blocks when possible.
    if (M // tm) * (N // tn) < 2 and tn % 256 == 0:
        tn //= 2
    assert M % tm == 0 and N % tn == 0 and K % tk == 0  # TODO(synk): pad ragged edges

    # Per-call row sums of the activations (cheap XLA reduction, single pass over inp).
    rowsum = jnp.sum(inp.astype(jnp.int32), axis=1, keepdims=True).astype(jnp.float32)

    acc_dtype = jnp.int32 if use_int8_mxu else jnp.float32
    grid = (M // tm, N // tn, K // tk)

    # Double-buffered int8 input tiles + f32 output + accumulator + small vectors,
    # capped so it also fits v7x's 64 MiB physical VMEM.
    vmem_need = (2 * tm * tk + 2 * tk * tn + 2 * tm * tn * 4 + tm * tn * 4
                 + 2 * (3 * tn + tm) * 4)
    vmem_limit = int(min(max(vmem_need + (8 << 20), 32 << 20), 60 << 20))

    kernel = functools.partial(qlinear_kernel, int8_mxu=use_int8_mxu)

    return pl.pallas_call(
        kernel,
        out_shape=jax.ShapeDtypeStruct((M, N), jnp.float32),
        grid_spec=pltpu.PrefetchScalarGridSpec(
            num_scalar_prefetch=0,
            grid=grid,
            in_specs=[
                pl.BlockSpec((tm, tk), lambda i, j, k: (i, k)),   # inp       [M, K] int8
                pl.BlockSpec((tk, tn), lambda i, j, k: (k, j)),   # w_t       [K, N] int8
                pl.BlockSpec((tm, 1), lambda i, j, k: (i, 0)),    # rowsum_A  [M, 1] f32
                pl.BlockSpec((1, tn), lambda i, j, k: (0, j)),    # scale     [1, N] f32
                pl.BlockSpec((1, tn), lambda i, j, k: (0, j)),    # scale*wzp [1, N] f32
                pl.BlockSpec((1, tn), lambda i, j, k: (0, j)),    # colterm   [1, N] f32
            ],
            out_specs=pl.BlockSpec((tm, tn), lambda i, j, k: (i, j)),
            scratch_shapes=[pltpu.VMEM((tm, tn), acc_dtype)],
        ),
        compiler_params=pltpu.CompilerParams(
            dimension_semantics=("parallel", "parallel", "arbitrary"),
            vmem_limit_bytes=vmem_limit,
        ),
        cost_estimate=pl.CostEstimate(
            flops=2 * M * N * K,
            transcendentals=0,
            # Account for re-streaming: A read N/tn times, W read M/tm times.
            bytes_accessed=(N // tn) * M * K + (M // tm) * K * N
                           + 4 * M * N + 4 * M + 3 * 4 * N,
        ),
    )(inp, w_t, rowsum, prepared["scale"], prepared["wzp_scaled"], prepared["colterm"])


def qlinear_pallas(inp, weight, bias, inp_scale, inp_zero_point,
                   weight_scales, weight_zero_points,
                   *, tm=None, tn=None, tk=None, use_int8_mxu=None):
    """Convenience wrapper (prepare + run). In production, call qlinear_prepare once
    at model-load time and reuse its result across calls."""
    prepared = qlinear_prepare(weight, bias, inp_scale, inp_zero_point,
                               weight_scales, weight_zero_points)
    return qlinear_pallas_prepared(inp, prepared, tm=tm, tn=tn, tk=tk,
                                   use_int8_mxu=use_int8_mxu)


def qlinear_ref(inp, weight, bias, inp_scale, inp_zero_point,
                weight_scales, weight_zero_points):
    inp_dq = (inp.astype(jnp.float32) - jnp.float32(inp_zero_point)) * jnp.float32(inp_scale)
    w_dq = (weight.astype(jnp.float32)
            - weight_zero_points.astype(jnp.float32)[:, None]) * weight_scales.astype(jnp.float32)[:, None]
    return jnp.matmul(inp_dq, w_dq.T, precision=jax.lax.Precision.HIGHEST) + bias[None, :]


if __name__ == "__main__":
    key = jax.random.PRNGKey(0)
    k1, k2, k3, k4, k5 = jax.random.split(key, 5)

    M, K, N = 128, 512, 512

    inp = jax.random.randint(k1, (M, K), -128, 128, dtype=jnp.int32).astype(jnp.int8)
    weight = jax.random.randint(k2, (N, K), -128, 128, dtype=jnp.int32).astype(jnp.int8)
    bias = jax.random.normal(k3, (N,), dtype=jnp.float32)

    inp_scale = jnp.float32(0.02)
    inp_zero_point = jnp.int32(3)
    weight_scales = jax.random.uniform(k4, (N,), jnp.float32, 0.005, 0.02)
    weight_zero_points = jax.random.randint(k5, (N,), -4, 5, dtype=jnp.int32)

    ref = qlinear_ref(inp, weight, bias, inp_scale, inp_zero_point,
                      weight_scales, weight_zero_points)

    # 1) Default path: auto-detected MXU mode (int8 on v5e/v6e, bf16 on v7x/other),
    #    large auto-picked tiles, hoisted weight prep.
    prepared = qlinear_prepare(weight, bias, inp_scale, inp_zero_point,
                               weight_scales, weight_zero_points)
    out = qlinear_pallas_prepared(inp, prepared)
    out = jax.block_until_ready(out)
    assert out.shape == (M, N) and out.dtype == jnp.float32
    assert jnp.allclose(out, ref, atol=2e-2, rtol=2e-3), "mismatch vs reference (default path)"

    # 2) bf16 fallback path with small explicit tiles: exercises the multi-step
    #    k-accumulation + pl.when init/finalize on every TPU generation.
    out2 = qlinear_pallas(inp, weight, bias, inp_scale, inp_zero_point,
                          weight_scales, weight_zero_points,
                          tm=64, tn=128, tk=128, use_int8_mxu=False)
    out2 = jax.block_until_ready(out2)
    assert jnp.allclose(out2, ref, atol=2e-2, rtol=2e-3), "mismatch vs reference (bf16 path)"

    print("KERNEL_OK")
</pallas_src>

<mosaic_0001>
module attributes {stable_mosaic.version = 11 : i64} {
  func.func @qlinear_kernel(%arg0: i32, %arg1: i32, %arg2: i32, %arg3: memref<128x512xi8, #tpu.memory_space<vmem>>, %arg4: memref<512x256xi8, #tpu.memory_space<vmem>>, %arg5: memref<128x1xf32, #tpu.memory_space<vmem>>, %arg6: memref<1x256xf32, #tpu.memory_space<vmem>>, %arg7: memref<1x256xf32, #tpu.memory_space<vmem>>, %arg8: memref<1x256xf32, #tpu.memory_space<vmem>>, %arg9: memref<128x256xf32, #tpu.memory_space<vmem>>, %arg10: memref<128x256xf32, #tpu.memory_space<vmem>>) attributes {dimension_semantics = [#tpu.dimension_semantics<parallel>, #tpu.dimension_semantics<parallel>, #tpu.dimension_semantics<arbitrary>], iteration_bounds = array<i64: 1, 2, 1>, scalar_prefetch = 0 : i64, scratch_operands = 1 : i64, tpu.core_type = #tpu.core_type<tc>, window_params = [{transform_indices = @transform_0, window_bounds = array<i64: 128, 512>}, {transform_indices = @transform_1, window_bounds = array<i64: 512, 256>}, {transform_indices = @transform_2, window_bounds = array<i64: 128, 1>}, {transform_indices = @transform_3, window_bounds = array<i64: 1, 256>}, {transform_indices = @transform_4, window_bounds = array<i64: 1, 256>}, {transform_indices = @transform_5, window_bounds = array<i64: 1, 256>}, {transform_indices = @transform_6, window_bounds = array<i64: 128, 256>}]} {
    %c0_i32 = arith.constant 0 : i32
    %0 = arith.cmpi eq, %arg2, %c0_i32 : i32
    %1 = arith.extui %0 : i1 to i32
    %c0_i32_0 = arith.constant 0 : i32
    %2 = arith.cmpi ne, %1, %c0_i32_0 : i32
    scf.if %2 {
      %cst_10 = arith.constant 0.000000e+00 : f32
      %14 = vector.broadcast %cst_10 : f32 to vector<128x256xf32>
      %c0_11 = arith.constant 0 : index
      %c0_12 = arith.constant 0 : index
      %15 = vector.load %arg10[%c0_11, %c0_12] : memref<128x256xf32, #tpu.memory_space<vmem>>, vector<128x256xf32>
      tpu.vector_store %arg10[%c0_11, %c0_12], %14 {strides = array<i32>} : memref<128x256xf32, #tpu.memory_space<vmem>>, vector<128x256xf32>,
    } else {
    }
    %c0 = arith.constant 0 : index
    %c0_1 = arith.constant 0 : index
    %3 = vector.load %arg10[%c0, %c0_1] : memref<128x256xf32, #tpu.memory_space<vmem>>, vector<128x256xf32>
    %c0_2 = arith.constant 0 : index
    %c0_3 = arith.constant 0 : index
    %4 = vector.load %arg3[%c0_2, %c0_3] : memref<128x512xi8, #tpu.memory_space<vmem>>, vector<128x512xi8>
    %5 = arith.sitofp %4 : vector<128x512xi8> to vector<128x512xbf16>
    %c0_4 = arith.constant 0 : index
    %c0_5 = arith.constant 0 : index
    %6 = vector.load %arg4[%c0_4, %c0_5] : memref<512x256xi8, #tpu.memory_space<vmem>>, vector<512x256xi8>
    %7 = arith.sitofp %6 : vector<512x256xi8> to vector<512x256xbf16>
    %cst = arith.constant dense<0.000000e+00> : vector<128x256xf32>
    %8 = tpu.matmul %5, %7, %cst {dimension_numbers = #tpu.dot_dimension_numbers<[1], [0], [0], [1], [0, 0, 1, 1], [], []>} : vector<128x512xbf16>, vector<512x256xbf16>, vector<128x256xf32> -> vector<128x256xf32>
    %9 = arith.addf %3, %8 : vector<128x256xf32>
    %c0_6 = arith.constant 0 : index
    %c0_7 = arith.constant 0 : index
    %10 = vector.load %arg10[%c0_6, %c0_7] : memref<128x256xf32, #tpu.memory_space<vmem>>, vector<128x256xf32>
    tpu.vector_store %arg10[%c0_6, %c0_7], %9 {strides = array<i32>} : memref<128x256xf32, #tpu.memory_space<vmem>>, vector<128x256xf32>,
    %c0_i32_8 = arith.constant 0 : i32
    %11 = arith.cmpi eq, %arg2, %c0_i32_8 : i32
    %12 = arith.extui %11 : i1 to i32
    %c0_i32_9 = arith.constant 0 : i32
    %13 = arith.cmpi ne, %12, %c0_i32_9 : i32
    scf.if %13 {
      %c0_10 = arith.constant 0 : index
      %c0_11 = arith.constant 0 : index
      %14 = vector.load %arg10[%c0_10, %c0_11] : memref<128x256xf32, #tpu.memory_space<vmem>>, vector<128x256xf32>
      %c0_12 = arith.constant 0 : index
      %c0_13 = arith.constant 0 : index
      %15 = vector.load %arg6[%c0_12, %c0_13] : memref<1x256xf32, #tpu.memory_space<vmem>>, vector<1x256xf32>
      %16 = vector.broadcast %15 : vector<1x256xf32> to vector<128x256xf32>
      %17 = arith.mulf %14, %16 : vector<128x256xf32>
      %c0_14 = arith.constant 0 : index
      %c0_15 = arith.constant 0 : index
      %18 = vector.load %arg5[%c0_14, %c0_15] : memref<128x1xf32, #tpu.memory_space<vmem>>, vector<128x1xf32>
      %c0_16 = arith.constant 0 : index
      %c0_17 = arith.constant 0 : index
      %19 = vector.load %arg7[%c0_16, %c0_17] : memref<1x256xf32, #tpu.memory_space<vmem>>, vector<1x256xf32>
      %20 = vector.broadcast %18 : vector<128x1xf32> to vector<128x256xf32>
      %21 = vector.broadcast %19 : vector<1x256xf32> to vector<128x256xf32>
      %22 = arith.mulf %20, %21 : vector<128x256xf32>
      %23 = arith.subf %17, %22 : vector<128x256xf32>
      %c0_18 = arith.constant 0 : index
      %c0_19 = arith.constant 0 : index
      %24 = vector.load %arg8[%c0_18, %c0_19] : memref<1x256xf32, #tpu.memory_space<vmem>>, vector<1x256xf32>
      %25 = vector.broadcast %24 : vector<1x256xf32> to vector<128x256xf32>
      %26 = arith.addf %23, %25 : vector<128x256xf32>
      %c0_20 = arith.constant 0 : index
      %c0_21 = arith.constant 0 : index
      %27 = vector.load %arg9[%c0_20, %c0_21] : memref<128x256xf32, #tpu.memory_space<vmem>>, vector<128x256xf32>
      tpu.vector_store %arg9[%c0_20, %c0_21], %26 {strides = array<i32>} : memref<128x256xf32, #tpu.memory_space<vmem>>, vector<128x256xf32>,
    } else {
    }
    return
  }
  func.func @transform_0(%arg0: i32, %arg1: i32, %arg2: i32) -> (i32, i32) {
    %c0_i32 = arith.constant 0 : i32
    return %arg0, %arg2 : i32, i32
  }
  func.func @transform_1(%arg0: i32, %arg1: i32, %arg2: i32) -> (i32, i32) {
    %c0_i32 = arith.constant 0 : i32
    return %arg2, %arg1 : i32, i32
  }
  func.func @transform_2(%arg0: i32, %arg1: i32, %arg2: i32) -> (i32, i32) {
    %c0_i32 = arith.constant 0 : i32
    %c0_i32_0 = arith.constant 0 : i32
    return %arg0, %c0_i32 : i32, i32
  }
  func.func @transform_3(%arg0: i32, %arg1: i32, %arg2: i32) -> (i32, i32) {
    %c0_i32 = arith.constant 0 : i32
    %c0_i32_0 = arith.constant 0 : i32
    return %c0_i32, %arg1 : i32, i32
  }
  func.func @transform_4(%arg0: i32, %arg1: i32, %arg2: i32) -> (i32, i32) {
    %c0_i32 = arith.constant 0 : i32
    %c0_i32_0 = arith.constant 0 : i32
    return %c0_i32, %arg1 : i32, i32
  }
  func.func @transform_5(%arg0: i32, %arg1: i32, %arg2: i32) -> (i32, i32) {
    %c0_i32 = arith.constant 0 : i32
    %c0_i32_0 = arith.constant 0 : i32
    return %c0_i32, %arg1 : i32, i32
  }
  func.func @transform_6(%arg0: i32, %arg1: i32, %arg2: i32) -> (i32, i32) {
    %c0_i32 = arith.constant 0 : i32
    return %arg0, %arg1 : i32, i32
  }
}

</mosaic_0001>

<bundles_post_ra>
// kernel: tpu_custom_call.1
= control target key start
LH: loop header
LB: loop body
LE: loop exit
PB: predicated region body
PF: predicated region fallthrough
CT: control target
= control target key end

     0   :  { %11 = vsyncpa [#allocation4], 0  ;;  %s2170_s0 = inlined_call_operand.vmem [shape: s8[128,512], index: 0, kind: input, shape index: {}]   ;;  %s2171_s1 = inlined_call_operand.hbm [shape: s8[512,512], index: 1, kind: input, shape index: {}]   ;;  %s2172_s2 = inlined_call_operand.vmem [shape: f32[128,1], index: 2, kind: input, shape index: {}]   ;;  %s2173_s3 = inlined_call_operand.vmem [shape: f32[1,512], index: 3, kind: input, shape index: {}]   ;;  %s2174_s4 = inlined_call_operand.vmem [shape: f32[1,512], index: 4, kind: input, shape index: {}]   ;;  %s2175_s5 = inlined_call_operand.vmem [shape: f32[1,512], index: 5, kind: input, shape index: {}]   ;;  %s2176_s6 = inlined_call_operand.hbm [shape: f32[128,512], index: 6, kind: output, shape index: {}]  }
   0x1   :  { %13 = vsyncpa [#allocation4 + $0x1], 0 }
   0x2   :  { %14 = vsyncpa [#allocation5], 0 }
   0x3   :  { %16 = vsyncpa [#allocation5 + $0x1], 0  ;;  %s1702_s21 = smov 0   ;;  %s1704_s22 = smov 0  }
   0x4   :  { %s1706_s23 = smov 0   ;;  %s1708_s24 = smov 0  }
   0x5   :  { %s1710_s25 = smov 0   ;;  %s1712_s26 = smov 0  }
   0x6 LB: > { %s1419_s27 = sadd.s32 4294967295, %s1656_s26   ;;  %s1420_s28 = sadd.s32 4294967294, %s1656_s26   ;;  %s1656_s26 = sphi %s1712_s26, %s22_s26   ;;  %s1652_s25 = sphi %s1710_s25, %s2190_s25   ;;  %s1648_s24 = sphi %s1708_s24, %s2189_s24   ;;  %s1644_s23 = sphi %s1706_s23, %s2188_s23   ;;  %s1640_s22 = sphi %s1704_s22, %s2187_s22   ;;  %s1636_s21 = sphi %s1702_s21, %s2186_s21  }
   0x7   : > { %s37_s29 = sadd.s32 1, %s1652_s25  ;;  %s78_s30 = sadd.s32 1, %s1644_s23 }
   0x8   : > { %p39_p0 = scmp.ge.s32.totalorder %s37_s29, 2  ;;  %p85_p1 = scmp.ne.s32.totalorder %s1644_s23, %s1640_s22 }
   0x9   : > { %p86_p2 = scmp.eq.s32.totalorder %s1656_s26, 0  ;;  %p91_p3 = scmp.ne.s32.totalorder %s1640_s22, %s1636_s21 }
   0xa   : > { %s2192_s29 = smov (%p39_p0, %s37_s29), 0  ;;  %p92_p5 = scmp.eq.s32.totalorder %s1419_s27, 0 }
   0xb   : > { %p1743_p4 = por %p86_p2, %p85_p1  ;;  %s74_s8 = ssub.s32 %s1652_s25, %s2192_s29 }
   0xc   : > { %p221_p6 = scmp.eq.s32.totalorder %s1419_s27, 1  ;;  %p76_p7 = scmp.eq.s32.totalorder %s74_s8, 0 }
   0xd   : > { %p1749_p8 = por %p92_p5, %p91_p3  ;;  %p227_p10 = scmp.eq.s32.totalorder %s1420_s28, 1 }
   0xe   : > { %p1753_p9 = por %p221_p6, %p85_p1  ;;  %p1485_p13 = scmp.lt.s32.totalorder %s1656_s26, 2 }
   0xf   : > { %s1758_s11 = scalar_select %p76_p7, %s1644_s23, %s78_s30  }
  0x10   : > { %s2180_s10 = scalar_select %p1753_p9, 1, 0 }
  0x11   : > { %p1760_p11 = por %p227_p10, %p91_p3  ;;  %s271_s13 = sand.u32 1, %s1644_s23  }
  0x12   : > { %s1425_s14 = sshll.u32 %s271_s13, 8  ;;  %s1439_s15 = sshll.u32 %s1652_s25, 8 }
  0x13   : > { %s2181_s12 = scalar_select %p1760_p11, 1, 0 }
  0x14   : > { %s1771_s18 = scalar_lea.hbm %s2171_s1, %s1439_s15  ;;  %s275_s19 = scalar_lea.vmem [#allocation3], %s1425_s14 }
  0x15   : > { %s285_s20 = sshll.u32 %s275_s19, 4  ;;  %p1777_p0 = pnand %p1485_p13, %p1743_p4  ;;  %s1773_s20 = int_to_ptr.vmem [resolvable:$true] %s285_s20 }
  0x16   : > { %s1781_s28 = scalar_lea.sflag [#allocation4], %s271_s13  ;;  %s1544_s30 = scalar_lea.hbm %s1771_s18, 4096 }
  0x17   : > { %p1545_p1 = scmp.ne.s32.totalorder %s1771_s18, %s1544_s30  ;;  %p1546_p2 = pneg %p1777_p0 }
  0x18   : > { %s1549_s7 = scalar_lea.hbm %s2171_s1, 8192  ;;  %p1550_p4 = scmp.lt.u32.totalorder %s1771_s18, %s2171_s1 }
  0x19   : > { %p1547_p3 = pnand %p1546_p2, %p1545_p1  ;;  %p1551_p6 = scmp.lt.u32.totalorder %s1549_s7, %s1544_s30 }
  0x1a   : > { %p1553_p10 = scmp.lt.u32.totalorder %s1544_s30, %s1771_s18 }
  0x1b   : > { %p1548_p5 = pneg %p1547_p3  ;;  %p1552_p7 = por %p1551_p6, %p1550_p4 }
  0x1d   : > { %p1554_p13 = por %p1553_p10, %p1552_p7 }
  0x1f   : > { %p1555_p12 = pnand %p1554_p13, %p1548_p5 }
  0x21   : > { %1558 = shalt.err (!%p1555_p12)
}
  0x22   : > { %s1559_s13 = scalar_lea.vmem %s1773_s20, 4096  ;;  %s1658_s17 = smov [#allocation3]  }
  0x23   : > { %p1560_p1 = scmp.ne.s32.totalorder %s1773_s20, %s1559_s13  ;;  %s1564_s19 = sshll.u32 %s1658_s17, 4  ;;  %s1565_s19 = int_to_ptr.vmem [resolvable:$false] %s1564_s19 }
  0x24   : > { %s1566_s8 = scalar_lea.vmem %s1565_s19, 8192  ;;  %p1567_p9 = scmp.lt.s32.totalorder %s1773_s20, %s1565_s19 }
  0x25   : > { %p1562_p3 = pnand %p1560_p1, %p1546_p2  ;;  %p1568_p4 = scmp.lt.s32.totalorder %s1566_s8, %s1559_s13 }
  0x27   : > { %p1563_p11 = pneg %p1562_p3  ;;  %p1569_p6 = por %p1568_p4, %p1567_p9 }
  0x29   : > { %p1570_p7 = pnand %p1569_p6, %p1563_p11 }
  0x2b   : > { %1573 = shalt.err (!%p1570_p7)
}
  0x2c   : > { %s1659_s30 = smov 512   ;;  %s1660_s14 = smov 256  }
  0x2d   : > { %s1661_s7 = smov 16   ;;  %p1428_p12 = scmp.ge.s32.totalorder %s1656_s26, 1 }
  0x2e   : > { %1480 = dma.hbm_to_vmem [thread:$0]  (!%p1777_p0), %s1771_s18, 4096, %s1773_s20, %s1781_s28, %s1659_s30, %s1660_s14, %s1661_s7  }
  0x2f   : > { %p317_p2 = scmp.lt.s32.totalorder %s1656_s26, 3 }
  0x31   : > { %p318_p5 = pnand %p1428_p12, %p317_p2 }
  0x32   : > { %s1812_s15 = sand.u32 (!%p318_p5), 1, %s1640_s22  }
  0x33   : > { %321 = sbr.rel (%p318_p5) target bundleno = 422 (0x1a6), region = 44  ;;  %s1429_s16 = sshll.u32 (!%p318_p5), %s1812_s15, 8 }
  0x34   : > { %s324_s13 = scalar_lea.sflag (!%p318_p5), [#allocation4], %s1812_s15  ;;  %s1818_s17 = scalar_lea.vmem (!%p318_p5), [#allocation3], %s1429_s16 }
  0x3a   : > { %1627 = dma.done.wait (%p1749_p8), %s324_s13, 4096  }
  0x3b   : > { %1629 = vsyncadd (%p1749_p8), %s324_s13, 4294963200  ;;  %v1662_v0 = vmov 0   ;;  %v537_v1 = vld [vmem:[%s1818_s17 + $0x8] sm:$0xff]  ;;  %v536_v3 = vld [vmem:[%s1818_s17] sm:$0xff]  ;;  %s1994_s19 = scalar_lea.vmem [#allocation6], %s1429_s16  ;;  %s1440_s16 = sshll.u32 %s1648_s24, 8 }
  0x3c   : > { %1542 = vset.pattern.permute.xlu0 %v1662_v0  ;;  %1543 = vset.pattern.permute.xlu1 %v1662_v0  ;;  %v553_v2 = vld [vmem:[%s1818_s17 + $0x88] sm:$0xff]  ;;  %v569_v4 = vunpack.c.l.s8.bf16 %v537_v1  ;;  %v571_v5 = vunpack.c.h.s8.bf16 %v537_v1  ;;  %v552_v8 = vld [vmem:[%s1818_s17 + $0x80] sm:$0xff]  ;;  %v568_v9 = vunpack.c.l.s8.bf16 %v536_v3  ;;  %v539_v11 = vld [vmem:[%s1818_s17 + $0x18] sm:$0xff]  ;;  %v570_v13 = vunpack.c.h.s8.bf16 %v536_v3  ;;  %s1266_s8 = sshll.u32 %s1994_s19, 4  ;;  %s2113_s14 = scalar_lea.hbm %s2176_s6, %s1440_s16  ;;  %s2117_s8 = int_to_ptr.vmem [resolvable:$true] %s1266_s8 }
  0x3d   : > { %v601_v6 = vunpack.c.l.s8.bf16 %v553_v2  ;;  %v603_v7 = vunpack.c.h.s8.bf16 %v553_v2  ;;  %v600_v10 = vunpack.c.l.s8.bf16 %v552_v8  ;;  %v555_v12 = vld [vmem:[%s1818_s17 + $0x98] sm:$0xff]  ;;  %v602_v14 = vunpack.c.h.s8.bf16 %v552_v8  ;;  %v538_v17 = vld [vmem:[%s1818_s17 + $0x10] sm:$0xff]  ;;  %v541_v23 = vld [vmem:[%s1818_s17 + $0x28] sm:$0xff]  ;;  %p2183_p11 = scmp.ne.s32.totalorder %s2180_s10, 0  ;;  %s1663_s13 = smov [#allocation6]  }
  0x3e   : > { %632 = vmatprep.subr.bf16.mxu1 %v569_v4  ;;  %v573_v15 = vunpack.c.l.s8.bf16 %v539_v11  ;;  %v605_v16 = vunpack.c.l.s8.bf16 %v555_v12  ;;  %v554_v18 = vld [vmem:[%s1818_s17 + $0x90] sm:$0xff]  ;;  %v572_v19 = vunpack.c.l.s8.bf16 %v538_v17  ;;  %v575_v21 = vunpack.c.h.s8.bf16 %v539_v11  ;;  %v557_v24 = vld [vmem:[%s1818_s17 + $0xa8] sm:$0xff]  ;;  %v540_v29 = vld [vmem:[%s1818_s17 + $0x20] sm:$0xff]  ;;  %s1578_s9 = sshll.u32 %s1663_s13, 4  ;;  %s1579_s9 = int_to_ptr.vmem [resolvable:$false] %s1578_s9 }
  0x3f   : > { %745 = vmatprep.subr.bf16.mxu0 %v601_v6  ;;  %633 = vmatpush1.bf16.msra.mxu1 %v568_v9  ;;  %v604_v20 = vunpack.c.l.s8.bf16 %v554_v18  ;;  %v607_v22 = vunpack.c.h.s8.bf16 %v555_v12  ;;  %v574_v25 = vunpack.c.h.s8.bf16 %v538_v17  ;;  %v606_v26 = vunpack.c.h.s8.bf16 %v554_v18  ;;  %v556_v30 = vld [vmem:[%s1818_s17 + $0xa0] sm:$0xff]  ;;  %v1839_v31 = vld [vmem:[%s2170_s0 + $0x8] sm:$0xff]  ;;  %v1844_v32 = vld [vmem:[%s2170_s0 + $0x18] sm:$0xff]  ;;  %p1581_p13 = scmp.lt.s32.totalorder %s2117_s8, %s1579_s9 }
  0x40   : > { %746 = vmatpush1.bf16.msra.mxu0 %v600_v10  ;;  %634 = vmatprep.subr.bf16.mxu1 %v571_v5  ;;  %v577_v27 = vunpack.c.l.s8.bf16 %v541_v23  ;;  %v609_v28 = vunpack.c.l.s8.bf16 %v557_v24  ;;  %v576_v33 = vunpack.c.l.s8.bf16 %v540_v29  ;;  %v608_v34 = vunpack.c.l.s8.bf16 %v556_v30  ;;  %v1001_v35 = vld [vmem:[%s2172_s2] sm:$0xff]  ;;  %v1003_v36 = vld [vmem:[%s2172_s2 + $0x10] sm:$0xff]  ;;  %v543_v41 = vld [vmem:[%s1818_s17 + $0x38] sm:$0xff] }
  0x41   : > { %747 = vmatprep.subr.bf16.mxu0 %v603_v7  ;;  %v579_v37 = vunpack.c.h.s8.bf16 %v541_v23  ;;  %v611_v38 = vunpack.c.h.s8.bf16 %v557_v24  ;;  %v505_v39 = vunpack.c.l.s8.bf16 %v1839_v31  ;;  %v507_v40 = vunpack.c.l.s8.bf16 %v1844_v32  ;;  %v559_v42 = vld [vmem:[%s1818_s17 + $0xb8] sm:$0xff]  ;;  %1020 = vperm.xlu0 %1542, %v1001_v35   ;;  %v1002_v43 = vld [vmem:[%s2172_s2 + $0x8] sm:$0xff]  ;;  %v542_v49 = vld [vmem:[%s1818_s17 + $0x30] sm:$0xff] }
  0x42   : > { %1030 = vperm.xlu1 %1543, %v1003_v36   ;;  %v1004_v44 = vld [vmem:[%s2172_s2 + $0x18] sm:$0xff]  ;;  %v578_v45 = vunpack.c.h.s8.bf16 %v540_v29  ;;  %v610_v46 = vunpack.c.h.s8.bf16 %v556_v30  ;;  %v581_v47 = vunpack.c.l.s8.bf16 %v543_v41  ;;  %v613_v48 = vunpack.c.l.s8.bf16 %v559_v42  ;;  %v558_v50 = vld [vmem:[%s1818_s17 + $0xb0] sm:$0xff]  ;;  %v1006_v51 = vld [vmem:[%s2172_s2 + $0x28] sm:$0xff] }
  0x43   : > { %635 = vmatpush1.bf16.msra.mxu1 %v570_v13  ;;  %664 = vmatprep.mubr.bf16.mxu1 %v505_v39  ;;  %v1005_v52 = vld [vmem:[%s2172_s2 + $0x20] sm:$0xff]  ;;  %v580_v53 = vunpack.c.l.s8.bf16 %v542_v49  ;;  %v612_v54 = vunpack.c.l.s8.bf16 %v558_v50  ;;  %v583_v55 = vunpack.c.h.s8.bf16 %v543_v41  ;;  %v615_v56 = vunpack.c.h.s8.bf16 %v559_v42  ;;  %v545_v57 = vld [vmem:[%s1818_s17 + $0x48] sm:$0xff]  ;;  %v1008_v59 = vld [vmem:[%s2172_s2 + $0x38] sm:$0xff] }
  0x44   : > { %748 = vmatpush1.bf16.msra.mxu0 %v602_v14  ;;  %636 = vmatprep.subr.bf16.mxu1 %v573_v15  ;;  %v561_v58 = vld [vmem:[%s1818_s17 + $0xc8] sm:$0xff]  ;;  %v1007_v60 = vld [vmem:[%s2172_s2 + $0x30] sm:$0xff]  ;;  %v582_v61 = vunpack.c.h.s8.bf16 %v542_v49  ;;  %v614_v62 = vunpack.c.h.s8.bf16 %v558_v50  ;;  %v585_v63 = vunpack.c.l.s8.bf16 %v545_v57  ;;  %v544_v1 = vld [vmem:[%s1818_s17 + $0x40] sm:$0xff]  ;;  %v587_v7 = vunpack.c.h.s8.bf16 %v545_v57 }
  0x45   : > { %749 = vmatprep.subr.bf16.mxu0 %v605_v16  ;;  %777 = vmatprep.mubr.bf16.mxu0 %v507_v40  ;;  %v617_v0 = vunpack.c.l.s8.bf16 %v561_v58  ;;  %v560_v2 = vld [vmem:[%s1818_s17 + $0xc0] sm:$0xff]  ;;  %v1010_v3 = vld [vmem:[%s2172_s2 + $0x48] sm:$0xff]  ;;  %v584_v5 = vunpack.c.l.s8.bf16 %v544_v1  ;;  %v619_v8 = vunpack.c.h.s8.bf16 %v561_v58  ;;  %v547_v9 = vld [vmem:[%s1818_s17 + $0x58] sm:$0xff]  ;;  %v586_v13 = vunpack.c.h.s8.bf16 %v544_v1 }
  0x46   : > { %1025 = vperm.xlu0 %1542, %v1002_v43   ;;  %1035 = vperm.xlu1 %1543, %v1004_v44   ;;  %v1009_v4 = vld [vmem:[%s2172_s2 + $0x40] sm:$0xff]  ;;  %v616_v6 = vunpack.c.l.s8.bf16 %v560_v2  ;;  %v563_v10 = vld [vmem:[%s1818_s17 + $0xd8] sm:$0xff]  ;;  %v1011_v12 = vld [vmem:[%s2172_s2 + $0x50] sm:$0xff]  ;;  %v618_v14 = vunpack.c.h.s8.bf16 %v560_v2  ;;  %v589_v15 = vunpack.c.l.s8.bf16 %v547_v9  ;;  %v591_v23 = vunpack.c.h.s8.bf16 %v547_v9 }
  0x47   : > { %637 = vmatpush1.bf16.msra.mxu1 %v572_v19  ;;  %v1012_v11 = vld [vmem:[%s2172_s2 + $0x58] sm:$0xff]  ;;  %v621_v16 = vunpack.c.l.s8.bf16 %v563_v10  ;;  %v546_v17 = vld [vmem:[%s1818_s17 + $0x50] sm:$0xff]  ;;  %v1014_v19 = vld [vmem:[%s2172_s2 + $0x68] sm:$0xff]  ;;  %v623_v24 = vunpack.c.h.s8.bf16 %v563_v10 }
  0x48   : > { %750 = vmatpush1.bf16.msra.mxu0 %v604_v20  ;;  %638 = vmatprep.subr.bf16.mxu1 %v575_v21  ;;  %v562_v18 = vld [vmem:[%s1818_s17 + $0xd0] sm:$0xff]  ;;  %v1013_v20 = vld [vmem:[%s2172_s2 + $0x60] sm:$0xff]  ;;  %v588_v21 = vunpack.c.l.s8.bf16 %v546_v17  ;;  %v590_v29 = vunpack.c.h.s8.bf16 %v546_v17  ;;  %v551_v41 = vld [vmem:[%s1818_s17 + $0x78] sm:$0xff] }
  0x49   : > { %751 = vmatprep.subr.bf16.mxu0 %v607_v22  ;;  %v620_v22 = vunpack.c.l.s8.bf16 %v562_v18  ;;  %v622_v30 = vunpack.c.h.s8.bf16 %v562_v18  ;;  %v548_v35 = vld [vmem:[%s1818_s17 + $0x60] sm:$0xff]  ;;  %v567_v42 = vld [vmem:[%s1818_s17 + $0xf8] sm:$0xff] }
  0x4a   : > { %1045 = vperm.xlu1 %1543, %v1006_v51   ;;  %1040 = vperm.xlu0 %1542, %v1005_v52   ;;  %v564_v36 = vld [vmem:[%s1818_s17 + $0xe0] sm:$0xff]  ;;  %v594_v43 = vunpack.c.h.s8.bf16 %v548_v35  ;;  %v599_v51 = vunpack.c.h.s8.bf16 %v551_v41  ;;  %v631_v52 = vunpack.c.h.s8.bf16 %v567_v42 }
  0x4b   : > { %639 = vmatpush1.bf16.msra.mxu1 %v574_v25  ;;  %v549_v25 = vld [vmem:[%s1818_s17 + $0x68] sm:$0xff]  ;;  %v626_v44 = vunpack.c.h.s8.bf16 %v564_v36 }
  0x4c   : > { %752 = vmatpush1.bf16.msra.mxu0 %v606_v26  ;;  %640 = vmatprep.subr.bf16.mxu1 %v577_v27  ;;  %v565_v26 = vld [vmem:[%s1818_s17 + $0xe8] sm:$0xff]  ;;  %v1016_v27 = vld [vmem:[%s2172_s2 + $0x78] sm:$0xff]  ;;  %v595_v39 = vunpack.c.h.s8.bf16 %v549_v25 }
  0x4d   : > { %753 = vmatprep.subr.bf16.mxu0 %v609_v28  ;;  %v1015_v28 = vld [vmem:[%s2172_s2 + $0x70] sm:$0xff]  ;;  %v627_v40 = vunpack.c.h.s8.bf16 %v565_v26 }
  0x4e   : > { %1055 = vperm.xlu1 %1543, %v1008_v59   ;;  %1050 = vperm.xlu0 %1542, %v1007_v60   ;;  %v509_v59 = vunpack.c.h.s8.bf16 %v1839_v31  ;;  %v511_v60 = vunpack.c.h.s8.bf16 %v1844_v32  ;;  %v492_v31 = vld [vmem:[%s2170_s0 + $0x20] sm:$0xff]  ;;  %v494_v32 = vld [vmem:[%s2170_s0 + $0x30] sm:$0xff] }
  0x4f   : > { %641 = vmatpush1.bf16.msra.mxu1 %v576_v33  ;;  %v593_v33 = vunpack.c.l.s8.bf16 %v549_v25  ;;  %v516_v9 = vunpack.c.h.s8.bf16 %v492_v31  ;;  %v518_v10 = vunpack.c.h.s8.bf16 %v494_v32  ;;  %v500_v25 = vld [vmem:[%s2170_s0 + $0x60] sm:$0xff] }
  0x50   : > { %754 = vmatpush1.bf16.msra.mxu0 %v608_v34  ;;  %642 = vmatprep.subr.bf16.mxu1 %v579_v37  ;;  %v625_v34 = vunpack.c.l.s8.bf16 %v565_v26  ;;  %v592_v37 = vunpack.c.l.s8.bf16 %v548_v35  ;;  %v502_v26 = vld [vmem:[%s2170_s0 + $0x70] sm:$0xff]  ;;  %v959_v35 = vlaneseq }
  0x51   : > { %755 = vmatprep.subr.bf16.mxu0 %v611_v38  ;;  %v624_v38 = vunpack.c.l.s8.bf16 %v564_v36 }
  0x52   : > { %1065 = vperm.xlu1 %1543, %v1010_v3   ;;  %1060 = vperm.xlu0 %1542, %v1009_v4   ;;  %v512_v3 = vunpack.c.l.s8.bf16 %v492_v31  ;;  %v514_v4 = vunpack.c.l.s8.bf16 %v494_v32  ;;  %v960_v36 = vshrl.u32 %v959_v35, 7 }
  0x53   : > { %643 = vmatpush1.bf16.msra.mxu1 %v578_v45  ;;  %v597_v45 = vunpack.c.l.s8.bf16 %v551_v41 }
  0x54   : > { %756 = vmatpush1.bf16.msra.mxu0 %v610_v46  ;;  %644 = vmatprep.subr.bf16.mxu1 %v581_v47  ;;  %v629_v46 = vunpack.c.l.s8.bf16 %v567_v42  ;;  %v550_v47 = vld [vmem:[%s1818_s17 + $0x70] sm:$0xff] }
  0x55   : > { %757 = vmatprep.subr.bf16.mxu0 %v613_v48  ;;  %v566_v48 = vld [vmem:[%s1818_s17 + $0xf0] sm:$0xff]  ;;  %v596_v49 = vunpack.c.l.s8.bf16 %v550_v47  ;;  %s1431_s17 = sshll.u32 %s1648_s24, 1  ;;  %s1250_s24 = scalar_lea.sflag [#allocation5], %s1812_s15 }
  0x56   : > { %1075 = vperm.xlu1 %1543, %v1012_v11   ;;  %1070 = vperm.xlu0 %1542, %v1011_v12   ;;  %v628_v50 = vunpack.c.l.s8.bf16 %v566_v48  ;;  %p404_p8 = scmp.lt.s32.totalorder %s1431_s17, 3 }
  0x57   : > { %645 = vmatpush1.bf16.msra.mxu1 %v580_v53  ;;  %v598_v53 = vunpack.c.h.s8.bf16 %v550_v47 }
  0x58   : > { %758 = vmatpush1.bf16.msra.mxu0 %v612_v54  ;;  %646 = vmatprep.subr.bf16.mxu1 %v583_v55  ;;  %v630_v54 = vunpack.c.h.s8.bf16 %v566_v48  ;;  %v488_v55 = vld [vmem:[%s2170_s0] sm:$0xff]  ;;  %s2194_s17 = smov (!%p404_p8, %s1431_s17), 3 }
  0x59   : > { %759 = vmatprep.subr.bf16.mxu0 %v615_v56  ;;  %v490_v56 = vld [vmem:[%s2170_s0 + $0x10] sm:$0xff]  ;;  %v504_v57 = vunpack.c.l.s8.bf16 %v488_v55  ;;  %s411_s7 = scalar_lea.vmem %s2174_s4, %s2194_s17  ;;  %s406_s18 = scalar_lea.vmem %s2173_s3, %s2194_s17 }
  0x5a   : > { %1085 = vperm.xlu1 %1543, %v1014_v19   ;;  %1080 = vperm.xlu0 %1542, %v1013_v20   ;;  %v506_v58 = vunpack.c.l.s8.bf16 %v490_v56  ;;  %v501_v19 = vld [vmem:[%s2170_s0 + $0x68] sm:$0xff]  ;;  %v503_v20 = vld [vmem:[%s2170_s0 + $0x78] sm:$0xff]  ;;  %v957_v41 = vld [vmem:[%s406_s18] sm:$0x3]  ;;  %s416_s28 = scalar_lea.vmem %s2175_s5, %s2194_s17  ;;  %s1580_s18 = scalar_lea.vmem %s1579_s9, 8192 }
  0x5b   : > { %647 = vmatpush1.bf16.msra.mxu1 %v582_v61  ;;  %v493_v61 = vld [vmem:[%s2170_s0 + $0x28] sm:$0xff] }
  0x5c   : > { %760 = vmatpush1.bf16.msra.mxu0 %v614_v62  ;;  %648 = vmatprep.subr.bf16.mxu1 %v585_v63  ;;  %v495_v62 = vld [vmem:[%s2170_s0 + $0x38] sm:$0xff]  ;;  %v508_v63 = vunpack.c.h.s8.bf16 %v488_v55  ;;  %v513_v1 = vunpack.c.l.s8.bf16 %v493_v61 }
  0x5d   : > { %761 = vmatprep.subr.bf16.mxu0 %v617_v0  ;;  %v510_v0 = vunpack.c.h.s8.bf16 %v490_v56  ;;  %v515_v2 = vunpack.c.l.s8.bf16 %v495_v62 }
  0x5e   : > { %1095 = vperm.xlu1 %1543, %v1016_v27   ;;  %1090 = vperm.xlu0 %1542, %v1015_v28   ;;  %v528_v27 = vunpack.c.l.s8.bf16 %v500_v25  ;;  %v530_v28 = vunpack.c.l.s8.bf16 %v502_v26 }
  0x5f   : > { %649 = vmatpush1.bf16.msra.mxu1 %v584_v5  ;;  %v517_v5 = vunpack.c.h.s8.bf16 %v493_v61 }
  0x60   : > { %762 = vmatpush1.bf16.msra.mxu0 %v616_v6  ;;  %650 = vmatprep.subr.bf16.mxu1 %v587_v7  ;;  %v519_v6 = vunpack.c.h.s8.bf16 %v495_v62  ;;  %v497_v7 = vld [vmem:[%s2170_s0 + $0x48] sm:$0xff] }
  0x61   : > { %763 = vmatprep.subr.bf16.mxu0 %v619_v8  ;;  %v499_v8 = vld [vmem:[%s2170_s0 + $0x58] sm:$0xff]  ;;  %v521_v11 = vunpack.c.l.s8.bf16 %v497_v7  ;;  %v525_v17 = vunpack.c.h.s8.bf16 %v497_v7 }
  0x62   : > { %v523_v12 = vunpack.c.l.s8.bf16 %v499_v8  ;;  %v527_v18 = vunpack.c.h.s8.bf16 %v499_v8 }
  0x63   : > { %651 = vmatpush1.bf16.msra.mxu1 %v586_v13  ;;  %v496_v13 = vld [vmem:[%s2170_s0 + $0x40] sm:$0xff] }
  0x64   : > { %764 = vmatpush1.bf16.msra.mxu0 %v618_v14  ;;  %652 = vmatprep.subr.bf16.mxu1 %v589_v15  ;;  %v498_v14 = vld [vmem:[%s2170_s0 + $0x50] sm:$0xff]  ;;  %v520_v15 = vunpack.c.l.s8.bf16 %v496_v13 }
  0x65   : > { %765 = vmatprep.subr.bf16.mxu0 %v621_v16  ;;  %v522_v16 = vunpack.c.l.s8.bf16 %v498_v14 }
  0x67   : > { %653 = vmatpush1.bf16.msra.mxu1 %v588_v21  ;;  %v524_v21 = vunpack.c.h.s8.bf16 %v496_v13 }
  0x68   : > { %766 = vmatpush1.bf16.msra.mxu0 %v620_v22  ;;  %654 = vmatprep.subr.bf16.mxu1 %v591_v23  ;;  %v526_v22 = vunpack.c.h.s8.bf16 %v498_v14  ;;  %v529_v23 = vunpack.c.l.s8.bf16 %v501_v19 }
  0x69   : > { %767 = vmatprep.subr.bf16.mxu0 %v623_v24  ;;  %v531_v24 = vunpack.c.l.s8.bf16 %v503_v20 }
  0x6b   : > { %655 = vmatpush1.bf16.msra.mxu1 %v590_v29  ;;  %v533_v29 = vunpack.c.h.s8.bf16 %v501_v19 }
  0x6c   : > { %768 = vmatpush1.bf16.msra.mxu0 %v622_v30  ;;  %656 = vmatprep.subr.bf16.mxu1 %v593_v33  ;;  %v535_v30 = vunpack.c.h.s8.bf16 %v503_v20  ;;  %v532_v33 = vunpack.c.h.s8.bf16 %v500_v25 }
  0x6d   : > { %769 = vmatprep.subr.bf16.mxu0 %v625_v34  ;;  %v534_v34 = vunpack.c.h.s8.bf16 %v502_v26 }
  0x6f   : > { %657 = vmatpush1.bf16.msra.mxu1 %v592_v37  ;;  %v961_v37 = vsub.s32 0, %v960_v36 }
  0x70   : > { %770 = vmatpush1.bf16.msra.mxu0 %v624_v38  ;;  %658 = vmatprep.subr.bf16.mxu1 %v595_v39  ;;  %v965_v39 = vsub.s32 1, %v960_v36 }
  0x71   : > { %771 = vmatprep.subr.bf16.mxu0 %v627_v40  ;;  %v1017_v40 = vld [vmem:[%s411_s7] sm:$0x3]  ;;  %s1574_s7 = scalar_lea.vmem %s2117_s8, 4096 }
  0x72   : > { %v1967_v42 = vrot.slane %v1017_v40, %v961_v37  ;;  %p1575_p9 = scmp.ne.s32.totalorder %s2117_s8, %s1574_s7  ;;  %p1582_p1 = scmp.lt.s32.totalorder %s1580_s18, %s1574_s7 }
  0x73   : > { %659 = vmatpush1.bf16.msra.mxu1 %v594_v43  ;;  %v1972_v43 = vrot.slane %v1017_v40, %v965_v39 }
  0x74   : > { %772 = vmatpush1.bf16.msra.mxu0 %v626_v44  ;;  %660 = vmatprep.subr.bf16.mxu1 %v597_v45  ;;  %v1974_v44 = vrot.slane %v957_v41, %v961_v37  ;;  %p1576_p0 = pnand %p1575_p9, %p2183_p11  ;;  %p1583_p3 = por %p1582_p1, %p1581_p13 }
  0x75   : > { %773 = vmatprep.subr.bf16.mxu0 %v629_v46 }
  0x76   : > { %p1577_p10 = pneg %p1576_p0 }
  0x77   : > { %661 = vmatpush1.bf16.msra.mxu1 %v596_v49  ;;  %v1173_v49 = vld [vmem:[%s416_s28] sm:$0x3] }
  0x78   : > { %774 = vmatpush1.bf16.msra.mxu0 %v628_v50  ;;  %662 = vmatprep.subr.bf16.mxu1 %v599_v51  ;;  %v1976_v50 = vrot.slane %v957_v41, %v965_v39  ;;  %p1584_p4 = pnand %p1583_p3, %p1577_p10 }
  0x79   : > { %775 = vmatprep.subr.bf16.mxu0 %v631_v52 }
  0x7b   : > { %663 = vmatpush1.bf16.msra.mxu1 %v598_v53 }
  0x7c   : > { %776 = vmatpush1.bf16.msra.mxu0 %v630_v54 }
  0x7e   : > { %665 = vmatmul.mubr.bf16.vlgmr.msra.gmra.mrb[0].mxu1 %v504_v57 }
  0x7f   : > { %778 = vmatmul.mubr.bf16.vlgmr.msra.gmra.mrb[0].mxu0 %v506_v58  ;;  %674 = vmatprep.mubr.bf16.mxu1 %v509_v59 }
  0x80   : > { %787 = vmatprep.mubr.bf16.mxu0 %v511_v60  ;;  %v1981_v60 = vrot.slane %v1173_v49, %v961_v37 }
  0x86   : > { %675 = vmatmul.mubr.bf16.gmra.mrb[4].mxu1 %v508_v63 }
  0x87   : > { %788 = vmatmul.mubr.bf16.gmra.mrb[4].mxu0 %v510_v0  ;;  %684 = vmatprep.mubr.bf16.mxu1 %v513_v1 }
  0x88   : > { %797 = vmatprep.mubr.bf16.mxu0 %v515_v2  ;;  %v1985_v2 = vrot.slane %v1173_v49, %v965_v39 }
  0x8e   : > { %685 = vmatmul.mubr.bf16.gmra.mrb[8].mxu1 %v512_v3 }
  0x8f   : > { %798 = vmatmul.mubr.bf16.gmra.mrb[8].mxu0 %v514_v4  ;;  %694 = vmatprep.mubr.bf16.mxu1 %v517_v5 }
  0x90   : > { %807 = vmatprep.mubr.bf16.mxu0 %v519_v6 }
  0x96   : > { %695 = vmatmul.mubr.bf16.gmra.mrb[12].mxu1 %v516_v9 }
  0x97   : > { %808 = vmatmul.mubr.bf16.gmra.mrb[12].mxu0 %v518_v10  ;;  %704 = vmatprep.mubr.bf16.mxu1 %v521_v11 }
  0x98   : > { %817 = vmatprep.mubr.bf16.mxu0 %v523_v12 }
  0x9e   : > { %705 = vmatmul.mubr.bf16.gmra.mrb[16].mxu1 %v520_v15 }
  0x9f   : > { %818 = vmatmul.mubr.bf16.gmra.mrb[16].mxu0 %v522_v16  ;;  %714 = vmatprep.mubr.bf16.mxu1 %v525_v17 }
  0xa0   : > { %827 = vmatprep.mubr.bf16.mxu0 %v527_v18 }
  0xa6   : > { %715 = vmatmul.mubr.bf16.gmra.mrb[20].mxu1 %v524_v21 }
  0xa7   : > { %828 = vmatmul.mubr.bf16.gmra.mrb[20].mxu0 %v526_v22  ;;  %724 = vmatprep.mubr.bf16.mxu1 %v529_v23 }
  0xa8   : > { %837 = vmatprep.mubr.bf16.mxu0 %v531_v24 }
  0xae   : > { %725 = vmatmul.mubr.bf16.gmra.mrb[24].mxu1 %v528_v27 }
  0xaf   : > { %838 = vmatmul.mubr.bf16.gmra.mrb[24].mxu0 %v530_v28  ;;  %734 = vmatprep.mubr.bf16.mxu1 %v533_v29 }
  0xb0   : > { %847 = vmatprep.mubr.bf16.mxu0 %v535_v30 }
  0xb6   : > { %735 = vmatmul.mubr.bf16.gmra.mrb[28].mxu1 %v532_v33 }
  0xb7   : > { %848 = vmatmul.mubr.bf16.gmra.mrb[28].mxu0 %v534_v34 }
  0xc0   : > { %v1021_v38 = vpop.permute.xlu0 %1020 }
  0xc1   : > { %v1031_v46 = vpop.permute.xlu1 %1030  ;;  %v1109_v51 = vmul.f32 %v1967_v42, %v1021_v38  ;;  %v1110_v55 = vmul.f32 %v1972_v43, %v1021_v38 }
  0xc2   : > { %v1113_v15 = vmul.f32 %v1967_v42, %v1031_v46  ;;  %v1114_v20 = vmul.f32 %v1972_v43, %v1031_v46 }
  0xc5   : > { %v1026_v45 = vpop.permute.xlu0 %1025  ;;  %v1036_v9 = vpop.permute.xlu1 %1035 }
  0xc6   : > { %v1111_v0 = vmul.f32 %v1967_v42, %v1026_v45  ;;  %v1112_v32 = vmul.f32 %v1972_v43, %v1026_v45  ;;  %v1115_v25 = vmul.f32 %v1967_v42, %v1036_v9  ;;  %v1116_v29 = vmul.f32 %v1972_v43, %v1036_v9 }
  0xc9   : > { %v1046_v40 = vpop.permute.xlu1 %1045  ;;  %v1041_v41 = vpop.permute.xlu0 %1040 }
  0xcd   : > { %v1056_v9 = vpop.permute.xlu1 %1055 }
 0x151   : > { %v666_v47 = vpop.f32.mrb[0].mxu1 }
 0x152   : > { %v779_v48 = vpop.f32.mrb[0].mxu0  ;;  %v668_v53 = vpop.f32.mrb[1].mxu1 }
 0x153   : > { %v780_v52 = vadd.f32 %v779_v48, %v666_v47  ;;  %v781_v54 = vpop.f32.mrb[1].mxu0  ;;  %v670_v57 = vpop.f32.mrb[2].mxu1 }
 0x154   : > { %v782_v56 = vadd.f32 %v781_v54, %v668_v53  ;;  %v783_v58 = vpop.f32.mrb[2].mxu0  ;;  %v672_v62 = vpop.f32.mrb[3].mxu1 }
 0x155   : > { %v969_v59 = vmul.f32 %v1974_v44, %v780_v52  ;;  %v784_v61 = vadd.f32 %v783_v58, %v670_v57  ;;  %v785_v63 = vpop.f32.mrb[3].mxu0 }
 0x156   : > { %v970_v1 = vmul.f32 %v1976_v50, %v782_v56  ;;  %v786_v31 = vadd.f32 %v785_v63, %v672_v62  ;;  %v1118_v56 = vmul.f32 %v1972_v43, %v1041_v41 }
 0x157   : > { %v1141_v3 = vsub.f32 %v969_v59, %v1109_v51  ;;  %v971_v4 = vmul.f32 %v1974_v44, %v784_v61  ;;  %v1117_v51 = vmul.f32 %v1967_v42, %v1041_v41  ;;  %v1119_v61 = vmul.f32 %v1967_v42, %v1046_v40 }
 0x158   : > { %v1142_v5 = vsub.f32 %v970_v1, %v1110_v55  ;;  %v972_v6 = vmul.f32 %v1976_v50, %v786_v31  ;;  %v1120_v31 = vmul.f32 %v1972_v43, %v1046_v40  ;;  %v1066_v40 = vpop.permute.xlu1 %1065 }
 0x159   : > { %v1185_v7 = vadd.f32 %v1981_v60, %v1141_v3  ;;  %v1143_v8 = vsub.f32 %v971_v4, %v1111_v0  ;;  %v676_v12 = vpop.f32.mrb[4].mxu1 }
 0x15a   : > { %v1186_v10 = vadd.f32 %v1985_v2, %v1142_v5  ;;  %v1144_v11 = vsub.f32 %v972_v6, %v1112_v32  ;;  %v789_v13 = vpop.f32.mrb[4].mxu0  ;;  %v678_v17 = vpop.f32.mrb[5].mxu1 }
 0x15b   : > { %1217 = vst [vmem:[%s1994_s19] sm:$0xff] %v1185_v7  ;;  %v1187_v14 = vadd.f32 %v1981_v60, %v1143_v8  ;;  %v790_v16 = vadd.f32 %v789_v13, %v676_v12  ;;  %v791_v18 = vpop.f32.mrb[5].mxu0  ;;  %v680_v22 = vpop.f32.mrb[6].mxu1 }
 0x15c   : > { %1218 = vst [vmem:[%s1994_s19 + $0x8] sm:$0xff] %v1186_v10  ;;  %v1188_v19 = vadd.f32 %v1985_v2, %v1144_v11  ;;  %v792_v21 = vadd.f32 %v791_v18, %v678_v17  ;;  %v793_v23 = vpop.f32.mrb[6].mxu0  ;;  %v682_v27 = vpop.f32.mrb[7].mxu1 }
 0x15d   : > { %1219 = vst [vmem:[%s1994_s19 + $0x10] sm:$0xff] %v1187_v14  ;;  %v973_v24 = vmul.f32 %v1974_v44, %v790_v16  ;;  %v794_v26 = vadd.f32 %v793_v23, %v680_v22  ;;  %v795_v28 = vpop.f32.mrb[7].mxu0  ;;  %v1051_v10 = vpop.permute.xlu0 %1050 }
 0x15e   : > { %1220 = vst [vmem:[%s1994_s19 + $0x18] sm:$0xff] %v1188_v19  ;;  %v974_v30 = vmul.f32 %v1976_v50, %v792_v21  ;;  %v796_v33 = vadd.f32 %v795_v28, %v682_v27  ;;  %v1121_v16 = vmul.f32 %v1967_v42, %v1051_v10  ;;  %v1122_v21 = vmul.f32 %v1972_v43, %v1051_v10  ;;  %v1076_v10 = vpop.permute.xlu1 %1075 }
 0x15f   : > { %v1145_v34 = vsub.f32 %v973_v24, %v1113_v15  ;;  %v975_v35 = vmul.f32 %v1974_v44, %v794_v26  ;;  %v1123_v26 = vmul.f32 %v1967_v42, %v1056_v9 }
 0x160   : > { %v1146_v36 = vsub.f32 %v974_v30, %v1114_v20  ;;  %v976_v37 = vmul.f32 %v1976_v50, %v796_v33  ;;  %v1124_v33 = vmul.f32 %v1972_v43, %v1056_v9 }
 0x161   : > { %v1189_v38 = vadd.f32 %v1981_v60, %v1145_v34  ;;  %v1147_v39 = vsub.f32 %v975_v35, %v1115_v25  ;;  %v686_v47 = vpop.f32.mrb[8].mxu1  ;;  %v1061_v41 = vpop.permute.xlu0 %1060 }
 0x162   : > { %v1190_v45 = vadd.f32 %v1985_v2, %v1146_v36  ;;  %v1148_v46 = vsub.f32 %v976_v37, %v1116_v29  ;;  %v799_v48 = vpop.f32.mrb[8].mxu0  ;;  %v688_v53 = vpop.f32.mrb[9].mxu1 }
 0x163   : > { %1221 = vst [vmem:[%s1994_s19 + $0x20] sm:$0xff] %v1189_v38  ;;  %v1191_v49 = vadd.f32 %v1981_v60, %v1147_v39  ;;  %v800_v52 = vadd.f32 %v799_v48, %v686_v47  ;;  %v801_v54 = vpop.f32.mrb[9].mxu0  ;;  %v690_v58 = vpop.f32.mrb[10].mxu1 }
 0x164   : > { %1222 = vst [vmem:[%s1994_s19 + $0x28] sm:$0xff] %v1190_v45  ;;  %v1192_v55 = vadd.f32 %v1985_v2, %v1148_v46  ;;  %v802_v57 = vadd.f32 %v801_v54, %v688_v53  ;;  %v803_v59 = vpop.f32.mrb[10].mxu0  ;;  %v692_v0 = vpop.f32.mrb[11].mxu1 }
 0x165   : > { %1223 = vst [vmem:[%s1994_s19 + $0x30] sm:$0xff] %v1191_v49  ;;  %v977_v62 = vmul.f32 %v1974_v44, %v800_v52  ;;  %v804_v63 = vadd.f32 %v803_v59, %v690_v58  ;;  %v805_v1 = vpop.f32.mrb[11].mxu0  ;;  %v1125_v52 = vmul.f32 %v1967_v42, %v1061_v41 }
 0x166   : > { %1224 = vst [vmem:[%s1994_s19 + $0x38] sm:$0xff] %v1192_v55  ;;  %v978_v32 = vmul.f32 %v1976_v50, %v802_v57  ;;  %v806_v3 = vadd.f32 %v805_v1, %v692_v0 }
 0x167   : > { %v1149_v4 = vsub.f32 %v977_v62, %v1117_v51  ;;  %v979_v5 = vmul.f32 %v1974_v44, %v804_v63 }
 0x168   : > { %v1150_v6 = vsub.f32 %v978_v32, %v1118_v56  ;;  %v980_v7 = vmul.f32 %v1976_v50, %v806_v3 }
 0x169   : > { %v1193_v8 = vadd.f32 %v1981_v60, %v1149_v4  ;;  %v1151_v11 = vsub.f32 %v979_v5, %v1119_v61  ;;  %v696_v14 = vpop.f32.mrb[12].mxu1  ;;  %v1127_v4 = vmul.f32 %v1967_v42, %v1066_v40 }
 0x16a   : > { %v1194_v12 = vadd.f32 %v1985_v2, %v1150_v6  ;;  %v1152_v13 = vsub.f32 %v980_v7, %v1120_v31  ;;  %v809_v15 = vpop.f32.mrb[12].mxu0  ;;  %v698_v19 = vpop.f32.mrb[13].mxu1  ;;  %v1126_v31 = vmul.f32 %v1972_v43, %v1061_v41  ;;  %v1128_v7 = vmul.f32 %v1972_v43, %v1066_v40 }
 0x16b   : > { %1225 = vst [vmem:[%s1994_s19 + $0x40] sm:$0xff] %v1193_v8  ;;  %v1195_v17 = vadd.f32 %v1981_v60, %v1151_v11  ;;  %v810_v18 = vadd.f32 %v809_v15, %v696_v14  ;;  %v811_v20 = vpop.f32.mrb[13].mxu0  ;;  %v700_v24 = vpop.f32.mrb[14].mxu1 }
 0x16c   : > { %1226 = vst [vmem:[%s1994_s19 + $0x48] sm:$0xff] %v1194_v12  ;;  %v1196_v22 = vadd.f32 %v1985_v2, %v1152_v13  ;;  %v812_v23 = vadd.f32 %v811_v20, %v698_v19  ;;  %v813_v25 = vpop.f32.mrb[14].mxu0  ;;  %v702_v29 = vpop.f32.mrb[15].mxu1 }
 0x16d   : > { %1227 = vst [vmem:[%s1994_s19 + $0x50] sm:$0xff] %v1195_v17  ;;  %v981_v27 = vmul.f32 %v1974_v44, %v810_v18  ;;  %v814_v28 = vadd.f32 %v813_v25, %v700_v24  ;;  %v815_v30 = vpop.f32.mrb[15].mxu0  ;;  %v1071_v11 = vpop.permute.xlu0 %1070 }
 0x16e   : > { %1228 = vst [vmem:[%s1994_s19 + $0x58] sm:$0xff] %v1196_v22  ;;  %v982_v34 = vmul.f32 %v1976_v50, %v812_v23  ;;  %v816_v35 = vadd.f32 %v815_v30, %v702_v29 }
 0x16f   : > { %v1153_v36 = vsub.f32 %v981_v27, %v1121_v16  ;;  %v983_v37 = vmul.f32 %v1974_v44, %v814_v28 }
 0x170   : > { %v1154_v38 = vsub.f32 %v982_v34, %v1122_v21  ;;  %v984_v39 = vmul.f32 %v1976_v50, %v816_v35 }
 0x171   : > { %v1197_v45 = vadd.f32 %v1981_v60, %v1153_v36  ;;  %v1155_v46 = vsub.f32 %v983_v37, %v1123_v26  ;;  %v706_v49 = vpop.f32.mrb[16].mxu1  ;;  %v1129_v26 = vmul.f32 %v1967_v42, %v1071_v11  ;;  %v1131_v36 = vmul.f32 %v1967_v42, %v1076_v10 }
 0x172   : > { %v1198_v47 = vadd.f32 %v1985_v2, %v1154_v38  ;;  %v1156_v48 = vsub.f32 %v984_v39, %v1124_v33  ;;  %v819_v51 = vpop.f32.mrb[16].mxu0  ;;  %v708_v55 = vpop.f32.mrb[17].mxu1  ;;  %v1130_v33 = vmul.f32 %v1972_v43, %v1071_v11  ;;  %v1132_v39 = vmul.f32 %v1972_v43, %v1076_v10 }
 0x173   : > { %1229 = vst [vmem:[%s1994_s19 + $0x60] sm:$0xff] %v1197_v45  ;;  %v1199_v53 = vadd.f32 %v1981_v60, %v1155_v46  ;;  %v820_v54 = vadd.f32 %v819_v51, %v706_v49  ;;  %v821_v56 = vpop.f32.mrb[17].mxu0  ;;  %v710_v59 = vpop.f32.mrb[18].mxu1 }
 0x174   : > { %1230 = vst [vmem:[%s1994_s19 + $0x68] sm:$0xff] %v1198_v47  ;;  %v1200_v57 = vadd.f32 %v1985_v2, %v1156_v48  ;;  %v822_v58 = vadd.f32 %v821_v56, %v708_v55  ;;  %v823_v61 = vpop.f32.mrb[18].mxu0  ;;  %v712_v0 = vpop.f32.mrb[19].mxu1 }
 0x175   : > { %1231 = vst [vmem:[%s1994_s19 + $0x70] sm:$0xff] %v1199_v53  ;;  %v985_v62 = vmul.f32 %v1974_v44, %v820_v54  ;;  %v824_v63 = vadd.f32 %v823_v61, %v710_v59  ;;  %v825_v1 = vpop.f32.mrb[19].mxu0  ;;  %v1086_v45 = vpop.permute.xlu1 %1085 }
 0x176   : > { %1232 = vst [vmem:[%s1994_s19 + $0x78] sm:$0xff] %v1200_v57  ;;  %v986_v32 = vmul.f32 %v1976_v50, %v822_v58  ;;  %v826_v3 = vadd.f32 %v825_v1, %v712_v0  ;;  %v1081_v46 = vpop.permute.xlu0 %1080 }
 0x177   : > { %v1157_v5 = vsub.f32 %v985_v62, %v1125_v52  ;;  %v987_v6 = vmul.f32 %v1974_v44, %v824_v63  ;;  %v1133_v63 = vmul.f32 %v1967_v42, %v1081_v46 }
 0x178   : > { %v1158_v8 = vsub.f32 %v986_v32, %v1126_v31  ;;  %v988_v9 = vmul.f32 %v1976_v50, %v826_v3  ;;  %v1134_v3 = vmul.f32 %v1972_v43, %v1081_v46 }
 0x179   : > { %v1201_v12 = vadd.f32 %v1981_v60, %v1157_v5  ;;  %v1159_v13 = vsub.f32 %v987_v6, %v1127_v4  ;;  %v716_v16 = vpop.f32.mrb[20].mxu1  ;;  %v1135_v6 = vmul.f32 %v1967_v42, %v1086_v45 }
 0x17a   : > { %v1202_v14 = vadd.f32 %v1985_v2, %v1158_v8  ;;  %v1160_v15 = vsub.f32 %v988_v9, %v1128_v7  ;;  %v829_v17 = vpop.f32.mrb[20].mxu0  ;;  %v718_v20 = vpop.f32.mrb[21].mxu1  ;;  %v1136_v9 = vmul.f32 %v1972_v43, %v1086_v45 }
 0x17b   : > { %1233 = vst [vmem:[%s1994_s19 + $0x80] sm:$0xff] %v1201_v12  ;;  %v1203_v18 = vadd.f32 %v1981_v60, %v1159_v13  ;;  %v830_v19 = vadd.f32 %v829_v17, %v716_v16  ;;  %v831_v21 = vpop.f32.mrb[21].mxu0  ;;  %v720_v24 = vpop.f32.mrb[22].mxu1 }
 0x17c   : > { %1234 = vst [vmem:[%s1994_s19 + $0x88] sm:$0xff] %v1202_v14  ;;  %v1204_v22 = vadd.f32 %v1985_v2, %v1160_v15  ;;  %v832_v23 = vadd.f32 %v831_v21, %v718_v20  ;;  %v833_v25 = vpop.f32.mrb[22].mxu0  ;;  %v722_v29 = vpop.f32.mrb[23].mxu1 }
 0x17d   : > { %1235 = vst [vmem:[%s1994_s19 + $0x90] sm:$0xff] %v1203_v18  ;;  %v989_v27 = vmul.f32 %v1974_v44, %v830_v19  ;;  %v834_v28 = vadd.f32 %v833_v25, %v720_v24  ;;  %v835_v30 = vpop.f32.mrb[23].mxu0  ;;  %v1096_v12 = vpop.permute.xlu1 %1095 }
 0x17e   : > { %1236 = vst [vmem:[%s1994_s19 + $0x98] sm:$0xff] %v1204_v22  ;;  %v990_v34 = vmul.f32 %v1976_v50, %v832_v23  ;;  %v836_v35 = vadd.f32 %v835_v30, %v722_v29  ;;  %v1091_v13 = vpop.permute.xlu0 %1090 }
 0x17f   : > { %v1161_v37 = vsub.f32 %v989_v27, %v1129_v26  ;;  %v991_v38 = vmul.f32 %v1974_v44, %v834_v28  ;;  %v1137_v28 = vmul.f32 %v1967_v42, %v1091_v13 }
 0x180   : > { %v1162_v40 = vsub.f32 %v990_v34, %v1130_v33  ;;  %v992_v41 = vmul.f32 %v1976_v50, %v836_v35  ;;  %v1138_v35 = vmul.f32 %v1972_v43, %v1091_v13 }
 0x181   : > { %v1205_v47 = vadd.f32 %v1981_v60, %v1161_v37  ;;  %v1163_v48 = vsub.f32 %v991_v38, %v1131_v36  ;;  %v726_v52 = vpop.f32.mrb[24].mxu1  ;;  %v1139_v38 = vmul.f32 %v1967_v42, %v1096_v12 }
 0x182   : > { %v1206_v49 = vadd.f32 %v1985_v2, %v1162_v40  ;;  %v1164_v51 = vsub.f32 %v992_v41, %v1132_v39  ;;  %v839_v53 = vpop.f32.mrb[24].mxu0  ;;  %v728_v56 = vpop.f32.mrb[25].mxu1  ;;  %v1140_v41 = vmul.f32 %v1972_v43, %v1096_v12 }
 0x183   : > { %1237 = vst [vmem:[%s1994_s19 + $0xa0] sm:$0xff] %v1205_v47  ;;  %v1207_v54 = vadd.f32 %v1981_v60, %v1163_v48  ;;  %v840_v55 = vadd.f32 %v839_v53, %v726_v52  ;;  %v841_v57 = vpop.f32.mrb[25].mxu0  ;;  %v730_v61 = vpop.f32.mrb[26].mxu1 }
 0x184   : > { %1238 = vst [vmem:[%s1994_s19 + $0xa8] sm:$0xff] %v1206_v49  ;;  %v1208_v58 = vadd.f32 %v1985_v2, %v1164_v51  ;;  %v842_v59 = vadd.f32 %v841_v57, %v728_v56  ;;  %v843_v62 = vpop.f32.mrb[26].mxu0  ;;  %v732_v31 = vpop.f32.mrb[27].mxu1 }
 0x185   : > { %1239 = vst [vmem:[%s1994_s19 + $0xb0] sm:$0xff] %v1207_v54  ;;  %v993_v0 = vmul.f32 %v1974_v44, %v840_v55  ;;  %v844_v1 = vadd.f32 %v843_v62, %v730_v61  ;;  %v845_v32 = vpop.f32.mrb[27].mxu0 }
 0x186   : > { %1240 = vst [vmem:[%s1994_s19 + $0xb8] sm:$0xff] %v1208_v58  ;;  %v994_v4 = vmul.f32 %v1976_v50, %v842_v59  ;;  %v846_v5 = vadd.f32 %v845_v32, %v732_v31 }
 0x187   : > { %v1165_v7 = vsub.f32 %v993_v0, %v1133_v63  ;;  %v995_v8 = vmul.f32 %v1974_v44, %v844_v1 }
 0x188   : > { %v1166_v10 = vsub.f32 %v994_v4, %v1134_v3  ;;  %v996_v11 = vmul.f32 %v1976_v50, %v846_v5 }
 0x189   : > { %v1209_v14 = vadd.f32 %v1981_v60, %v1165_v7  ;;  %v1167_v15 = vsub.f32 %v995_v8, %v1135_v6  ;;  %v736_v18 = vpop.f32.mrb[28].mxu1 }
 0x18a   : > { %v1210_v16 = vadd.f32 %v1985_v2, %v1166_v10  ;;  %v1168_v17 = vsub.f32 %v996_v11, %v1136_v9  ;;  %v849_v19 = vpop.f32.mrb[28].mxu0  ;;  %v738_v22 = vpop.f32.mrb[29].mxu1 }
 0x18b   : > { %1241 = vst [vmem:[%s1994_s19 + $0xc0] sm:$0xff] %v1209_v14  ;;  %v1211_v20 = vadd.f32 %v1981_v60, %v1167_v15  ;;  %v850_v21 = vadd.f32 %v849_v19, %v736_v18  ;;  %v851_v23 = vpop.f32.mrb[29].mxu0  ;;  %v740_v26 = vpop.f32.mrb[30].mxu1 }
 0x18c   : > { %1242 = vst [vmem:[%s1994_s19 + $0xc8] sm:$0xff] %v1210_v16  ;;  %v1212_v24 = vadd.f32 %v1985_v2, %v1168_v17  ;;  %v852_v25 = vadd.f32 %v851_v23, %v738_v22  ;;  %v853_v27 = vpop.f32.mrb[30].mxu0  ;;  %v742_v33 = vpop.f32.mrb[31].mxu1 }
 0x18d   : > { %1243 = vst [vmem:[%s1994_s19 + $0xd0] sm:$0xff] %v1211_v20  ;;  %v997_v29 = vmul.f32 %v1974_v44, %v850_v21  ;;  %v854_v30 = vadd.f32 %v853_v27, %v740_v26  ;;  %v855_v34 = vpop.f32.mrb[31].mxu0 }
 0x18e   : > { %1244 = vst [vmem:[%s1994_s19 + $0xd8] sm:$0xff] %v1212_v24  ;;  %v998_v36 = vmul.f32 %v1976_v50, %v852_v25  ;;  %v856_v37 = vadd.f32 %v855_v34, %v742_v33 }
 0x18f   : > { %v1169_v39 = vsub.f32 %v997_v29, %v1137_v28  ;;  %v999_v40 = vmul.f32 %v1974_v44, %v854_v30 }
 0x190   : > { %v1170_v45 = vsub.f32 %v998_v36, %v1138_v35  ;;  %v1000_v46 = vmul.f32 %v1976_v50, %v856_v37 }
 0x191   : > { %v1213_v47 = vadd.f32 %v1981_v60, %v1169_v39  ;;  %v1171_v48 = vsub.f32 %v999_v40, %v1139_v38 }
 0x192   : > { %v1214_v42 = vadd.f32 %v1985_v2, %v1170_v45  ;;  %v1172_v49 = vsub.f32 %v1000_v46, %v1140_v41 }
 0x193   : > { %1245 = vst [vmem:[%s1994_s19 + $0xe0] sm:$0xff] %v1213_v47  ;;  %v1215_v43 = vadd.f32 %v1981_v60, %v1171_v48 }
 0x194   : > { %1246 = vst [vmem:[%s1994_s19 + $0xe8] sm:$0xff] %v1214_v42  ;;  %v1216_v44 = vadd.f32 %v1985_v2, %v1172_v49 }
 0x195   : > { %1247 = vst [vmem:[%s1994_s19 + $0xf0] sm:$0xff] %v1215_v43 }
 0x196   : > { %1248 = vst [vmem:[%s1994_s19 + $0xf8] sm:$0xff] %v1216_v44 }
 0x197   : > { %1587 = shalt.err (!%p1584_p4)
}
 0x198   : > { %s1588_s20 = scalar_lea.hbm %s2113_s14, 4096  ;;  %s1592_s19 = scalar_lea.hbm %s2176_s6, 8192 }
 0x199   : > { %p1589_p6 = scmp.ne.s32.totalorder %s2113_s14, %s1588_s20  ;;  %p1593_p2 = scmp.lt.u32.totalorder %s2113_s14, %s2176_s6 }
 0x19a   : > { %p1594_p5 = scmp.lt.u32.totalorder %s1592_s19, %s1588_s20  ;;  %p1596_p9 = scmp.lt.u32.totalorder %s1588_s20, %s2113_s14 }
 0x19b   : > { %p1590_p7 = pnand %p1589_p6, %p2183_p11 }
 0x19c   : > { %p1595_p8 = por %p1594_p5, %p1593_p2 }
 0x19d   : > { %p1591_p12 = pneg %p1590_p7 }
 0x19e   : > { %p1597_p0 = por %p1596_p9, %p1595_p8 }
 0x1a0   : > { %p1598_p10 = pnand %p1597_p0, %p1591_p12 }
 0x1a2   : > { %1601 = shalt.err (!%p1598_p10)
}
 0x1a3   : > { %s1664_s30 = smov 256   ;;  %s1665_s7 = smov 512  }
 0x1a4   : > { %s1666_s13 = smov 16  }
 0x1a5   : > { %1475 = dma.vmem_to_hbm [thread:$0]  (%p2183_p11), %s2117_s8, 4096, %s2113_s14, %s1250_s24, %s1664_s30, %s1665_s7, %s1666_s13  }
 0x1a6 PF: > { %s1281_s9 = sand.u32 1, %s1636_s21   ;;  %p2184_p13 = scmp.ne.s32.totalorder %s2181_s12, 0 }
 0x1a7   : > { %p2185_p1 = scmp.ge.s32.totalorder %s1656_s26, 2  ;;  %s1282_s18 = scalar_lea.sflag [#allocation5], %s1281_s9 }
 0x1a9   : > { %p1482_p3 = pnand %p2185_p1, %p2184_p13 }
 0x1ab   : > { %1631 = dma.done.wait (!%p1482_p3), %s1282_s18, 4096  }
 0x1ac   : > { %1633 = vsyncadd (!%p1482_p3), %s1282_s18, 4294963200  ;;  %s22_s26 = sadd.s32 1, %s1656_s26   ;;  %s2186_s21 = smov %s1640_s22 }
 0x1ad   : > { %p19_p4 = scmp.ge.s32.totalorder %s22_s26, 4   ;;  %s2187_s22 = smov %s1644_s23 }
 0x1ae   : > { %s2188_s23 = smov %s1758_s11  ;;  %s2189_s24 = smov %s1652_s25 }
 0x1af   : > { %s2190_s25 = smov %s2192_s29  ;;  %21 = sbr.rel (!%p19_p4) target bundleno = 6 (0x6), region = 112 }
 0x1b6   :  { %1287 = vsyncpa [#allocation4], 1 }
 0x1b7   :  { %1289 = vsyncpa [#allocation4 + $0x1], 1 }
 0x1b8   :  { %1290 = vsyncpa [#allocation5], 1 }
 0x1b9   :  { %1292 = vsyncpa [#allocation5 + $0x1], 1 }

</bundles_post_ra>
